<compile_context>
chip_gen: v6e
topology: v6e:2x2x1
jax: 0.10.0
libtpu: 0.0.40
codegen_flags: <defaults>
</compile_context>

<pallas_src>
import functools
import math

import jax
import jax.numpy as jnp
from jax.experimental import pallas as pl
from jax.experimental.pallas import tpu as pltpu


def _vq_kernel(z_ref, g_ref, cb_ref, csqr_ref,
               zq_ref, idx_ref, kl_ref, cl_ref, *,
               inv_temp, inv_mean, log_slots):
    """Per-tile math.

    z_ref:    (T, D)  latent rows
    g_ref:    (T, S)  gumbel noise rows
    cb_ref:   (S, D)  full codebook (resident)
    csqr_ref: (1, S)  precomputed ||c||^2
    zq_ref:   (D, T)  quantized output, transposed (lane-dense store)
    idx_ref:  (T, 1)  hard indices
    kl_ref:   (1,1,1) per-tile KL partial
    cl_ref:   (1,1,1) per-tile commit-loss partial
    """
    z = z_ref[...].astype(jnp.float32)
    gumbel = g_ref[...].astype(jnp.float32)
    cb = cb_ref[...].astype(jnp.float32)
    c_sqr = csqr_ref[...].astype(jnp.float32)
    slots = cb.shape[0]

    # squared euclidean distances: ||c||^2 + ||z||^2 - 2 z.c   (||c||^2 hoisted)
    z_sqr = jnp.sum(z * z, axis=1, keepdims=True)                       # (T, 1)
    cross = jax.lax.dot_general(z, cb, (((1,), (1,)), ((), ())),        # z @ cb^T
                                preferred_element_type=jnp.float32)
    dist = c_sqr + z_sqr - 2.0 * cross                                  # (T, S)
    logits = -dist

    # RelaxedOneHotCategorical rsample == softmax((logits + gumbel) / temperature)
    y = (logits + gumbel) * inv_temp
    y_max = jnp.max(y, axis=1, keepdims=True)                           # shared below
    ey = jnp.exp(y - y_max)
    inv_sum_ey = pl.reciprocal(jnp.sum(ey, axis=1, keepdims=True), approx=True)
    soft_onehot = ey * inv_sum_ey                                       # (T, S)

    # hard indices = first argmax over slots (argmax of softmax == argmax of y)
    col = jax.lax.broadcasted_iota(jnp.int32, y.shape, 1)
    idx_ref[...] = jnp.min(jnp.where(y >= y_max, col, slots),
                           axis=1, keepdims=True).astype(jnp.int32)     # (T, 1)

    # z_q^T = cb^T @ soft^T  -> lane-dense (D, T) output block
    zq_ref[...] = jax.lax.dot_general(
        cb, soft_onehot, (((0,), (1,)), ((), ())),
        preferred_element_type=jnp.float32).astype(zq_ref.dtype)

    # probs = softmax(logits) (temperature-free); log-softmax shares the same sums
    l = logits - jnp.max(logits, axis=1, keepdims=True)
    el = jnp.exp(l)
    sum_el = jnp.sum(el, axis=1, keepdims=True)
    probs = el * pl.reciprocal(sum_el, approx=True)
    log_probs = l - jnp.log(sum_el)                                     # 1 log per row

    kl_part = jnp.sum(probs * (log_probs + log_slots)) * inv_mean
    cl_part = jnp.sum(probs * dist) * inv_mean
    kl_ref[...] = jnp.full(kl_ref.shape, kl_part, dtype=kl_ref.dtype)
    cl_ref[...] = jnp.full(cl_ref.shape, cl_part, dtype=cl_ref.dtype)


def vq_codebook_forward(z_e, codebook, seed=0, *, codebook_groups,
                        temperature=0.4, tile_n=512, gumbel_noise=None):
    """Pallas implementation of VQCodebook.forward (soft=True path).

    z_e: (bs, groups*D, w), codebook: (S, D).  Returns (z_q, hard_indices, KL, commit).
    If `gumbel_noise` (shape (bs*groups*w, S), f32) is given it is used verbatim
    (useful for exact verification against a reference); otherwise it is drawn
    deterministically from `seed`.
    """
    bs, feat_dim, w = z_e.shape
    S, D = codebook.shape
    groups = codebook_groups
    assert feat_dim == groups * D, "latent_dim mismatch"

    # (bs, latent_dim, w) -> (bs, groups, D, w) -> (bs, groups, w, D) -> (N, D)
    z_flat = (z_e.reshape(bs, groups, D, w)
                  .transpose(0, 1, 3, 2)
                  .reshape(bs * groups * w, D))
    N = z_flat.shape[0]
    assert N % 8 == 0, "bs*groups*w must be a multiple of 8"

    if gumbel_noise is None:
        gumbel_noise = jax.random.gumbel(jax.random.PRNGKey(seed), (N, S),
                                         dtype=jnp.float32)
    assert gumbel_noise.shape == (N, S)

    # largest row tile <= tile_n that is a multiple of 8 and divides N
    # (on v7x, with only 64 MiB VMEM, keep tile_n around 256-512)
    tile_n = min(tile_n, N)
    tile_n -= tile_n % 8
    while N % tile_n:
        tile_n -= 8
    num_tiles = N // tile_n

    # hoisted codebook constant: ||c||^2 as a resident (1, S) f32 row
    cb_sqr = jnp.sum(codebook.astype(jnp.float32) ** 2, axis=1, keepdims=True).T

    kernel = functools.partial(
        _vq_kernel,
        inv_temp=1.0 / float(temperature),
        inv_mean=1.0 / float(N * S),
        log_slots=float(math.log(S)),
    )

    out_shape = (
        jax.ShapeDtypeStruct((D, N), jnp.float32),             # z_q^T (lane-dense)
        jax.ShapeDtypeStruct((N, 1), jnp.int32),               # hard indices
        jax.ShapeDtypeStruct((num_tiles, 1, 1), jnp.float32),  # per-tile KL partials
        jax.ShapeDtypeStruct((num_tiles, 1, 1), jnp.float32),  # per-tile commit partials
    )
    out_specs = (
        pl.BlockSpec((D, tile_n), lambda i: (0, i)),
        pl.BlockSpec((tile_n, 1), lambda i: (i, 0)),
        pl.BlockSpec((1, 1, 1), lambda i: (i, 0, 0)),
        pl.BlockSpec((1, 1, 1), lambda i: (i, 0, 0)),
    )
    in_specs = [
        pl.BlockSpec((tile_n, D), lambda i: (i, 0)),           # z rows
        pl.BlockSpec((tile_n, S), lambda i: (i, 0)),           # gumbel rows
        pl.BlockSpec((S, D), lambda i: (0, 0)),                # full codebook (resident)
        pl.BlockSpec((1, S), lambda i: (0, 0)),                # ||c||^2 (resident)
    ]

    zq_t, idx_flat, kl_parts, cl_parts = pl.pallas_call(
        kernel,
        out_shape=out_shape,
        grid=(num_tiles,),
        in_specs=in_specs,
        out_specs=out_specs,
        compiler_params=pltpu.CompilerParams(
            dimension_semantics=("parallel",),
            vmem_limit_bytes=32 * 1024 * 1024,
        ),
    )(z_flat, gumbel_noise, codebook, cb_sqr)

    # (D, N) -> (D, bs, groups, w) -> (bs, groups, D, w) -> (bs, latent_dim, w)
    z_q = (zq_t.reshape(D, bs, groups, w)
               .transpose(1, 2, 0, 3)
               .reshape(bs, groups * D, w)).astype(z_e.dtype)
    hard_indices = idx_flat.reshape(bs, groups, w)
    kl = jnp.sum(kl_parts)
    commit_loss = jnp.sum(cl_parts)
    return z_q, hard_indices, kl, commit_loss


def _reference_forward(z_e, codebook, gumbel, *, codebook_groups, temperature):
    """Pure-JAX reference mirroring the PyTorch math, sharing gumbel noise."""
    bs, feat_dim, w = z_e.shape
    S, D = codebook.shape
    groups = codebook_groups
    z = (z_e.reshape(bs, groups, D, w).transpose(0, 1, 3, 2)
             .reshape(bs * groups * w, D)).astype(jnp.float32)
    cb = codebook.astype(jnp.float32)
    dist = (jnp.sum(cb ** 2, axis=1)[None, :]
            + jnp.sum(z ** 2, axis=1, keepdims=True)
            - 2.0 * z @ cb.T)
    logits = -dist
    soft = jax.nn.softmax((logits + gumbel) / temperature, axis=1)
    idx = jnp.argmax(soft, axis=1).reshape(bs, groups, w)
    z_q = (soft @ cb).reshape(bs, groups, w, D).transpose(0, 1, 3, 2)
    z_q = z_q.reshape(bs, groups * D, w)
    probs = jax.nn.softmax(logits, axis=1)
    kl = jnp.mean(probs * (jnp.log(probs + 1e-9) + math.log(S)))
    cl = jnp.mean(probs * dist)
    return z_q, idx, kl, cl


if __name__ == "__main__":
    # module hyperparameters (small, consistent with the PyTorch __init__)
    codebook_slots = 64
    codebook_dim = 16
    codebook_groups = 2
    temperature = 0.4
    latent_dim = codebook_dim * codebook_groups   # 32

    bs, w = 2, 8

    key = jax.random.PRNGKey(0)
    k_cb, k_ze, k_g = jax.random.split(key, 3)

    codebook = jax.random.normal(k_cb, (codebook_slots, codebook_dim),
                                 dtype=jnp.float32)
    z_e = jax.random.normal(k_ze, (bs, latent_dim, w), dtype=jnp.float32)

    N = bs * codebook_groups * w

    # ---- path 1: externally supplied gumbel noise (exact check vs reference) ----
    gumbel = jax.random.gumbel(k_g, (N, codebook_slots), dtype=jnp.float32)
    z_q, indices, kl, commit_loss = vq_codebook_forward(
        z_e, codebook, codebook_groups=codebook_groups, temperature=temperature,
        gumbel_noise=gumbel)
    jax.block_until_ready((z_q, indices, kl, commit_loss))

    z_q_ref, idx_r, kl_r, cl_r = _reference_forward(
        z_e, codebook, gumbel,
        codebook_groups=codebook_groups, temperature=temperature)

    assert z_q.shape == (bs, latent_dim, w)
    assert indices.shape == (bs, codebook_groups, w)
    assert jnp.allclose(z_q, z_q_ref, atol=5e-3, rtol=5e-3)
    assert jnp.array_equal(indices, idx_r.astype(jnp.int32))
    assert jnp.allclose(kl, kl_r, atol=5e-3, rtol=5e-3)
    assert jnp.allclose(commit_loss, cl_r, atol=5e-3, rtol=5e-3)

    # ---- path 2: wrapper-drawn (seeded) gumbel noise ----
    # The noise differs from path 1, so only noise-free quantities (KL / commit, which
    # depend on probs = softmax(logits), not on the gumbel sample) are checked exactly.
    z_q2, idx2, kl2, cl2 = vq_codebook_forward(
        z_e, codebook, seed=1234,
        codebook_groups=codebook_groups, temperature=temperature)
    jax.block_until_ready((z_q2, idx2, kl2, cl2))

    assert z_q2.shape == (bs, latent_dim, w)
    assert jnp.allclose(kl2, kl_r, atol=5e-3, rtol=5e-3)       # noise-free
    assert jnp.allclose(cl2, cl_r, atol=5e-3, rtol=5e-3)       # noise-free
    assert jnp.all((idx2 >= 0) & (idx2 < codebook_slots))
    # each z_q element is (approximately) a convex combination of codebook entries
    cb_min = jnp.min(codebook, axis=0)
    cb_max = jnp.max(codebook, axis=0)
    zq2_g = z_q2.reshape(bs, codebook_groups, codebook_dim, w)
    assert jnp.all(zq2_g >= cb_min[None, None, :, None] - 1e-2)
    assert jnp.all(zq2_g <= cb_max[None, None, :, None] + 1e-2)

    print("KERNEL_OK")
</pallas_src>

<mosaic_0001>
module attributes {stable_mosaic.version = 11 : i64} {
  func.func @_vq_kernel(%arg0: i32, %arg1: memref<32x16xf32, #tpu.memory_space<vmem>>, %arg2: memref<32x64xf32, #tpu.memory_space<vmem>>, %arg3: memref<64x16xf32, #tpu.memory_space<vmem>>, %arg4: memref<1x64xf32, #tpu.memory_space<vmem>>, %arg5: memref<16x32xf32, #tpu.memory_space<vmem>>, %arg6: memref<32x1xi32, #tpu.memory_space<vmem>>, %arg7: memref<1x1x1xf32, #tpu.memory_space<vmem>>, %arg8: memref<1x1x1xf32, #tpu.memory_space<vmem>>) attributes {dimension_semantics = [#tpu.dimension_semantics<parallel>], iteration_bounds = array<i64: 1>, scalar_prefetch = 0 : i64, scratch_operands = 0 : i64, tpu.core_type = #tpu.core_type<tc>, window_params = [{transform_indices = @transform_0, window_bounds = array<i64: 32, 16>}, {transform_indices = @transform_1, window_bounds = array<i64: 32, 64>}, {pipeline_mode = #tpu.pipeline_mode<synchronous>, transform_indices = @transform_2, window_bounds = array<i64: 64, 16>}, {pipeline_mode = #tpu.pipeline_mode<synchronous>, transform_indices = @transform_3, window_bounds = array<i64: 1, 64>}, {transform_indices = @transform_4, window_bounds = array<i64: 16, 32>}, {transform_indices = @transform_5, window_bounds = array<i64: 32, 1>}, {transform_indices = @transform_6, window_bounds = array<i64: 1, 1, 1>}, {transform_indices = @transform_7, window_bounds = array<i64: 1, 1, 1>}]} {
    %c0 = arith.constant 0 : index
    %c0_0 = arith.constant 0 : index
    %0 = vector.load %arg1[%c0, %c0_0] : memref<32x16xf32, #tpu.memory_space<vmem>>, vector<32x16xf32>
    %c0_1 = arith.constant 0 : index
    %c0_2 = arith.constant 0 : index
    %1 = vector.load %arg2[%c0_1, %c0_2] : memref<32x64xf32, #tpu.memory_space<vmem>>, vector<32x64xf32>
    %c0_3 = arith.constant 0 : index
    %c0_4 = arith.constant 0 : index
    %2 = vector.load %arg3[%c0_3, %c0_4] : memref<64x16xf32, #tpu.memory_space<vmem>>, vector<64x16xf32>
    %c0_5 = arith.constant 0 : index
    %c0_6 = arith.constant 0 : index
    %3 = vector.load %arg4[%c0_5, %c0_6] : memref<1x64xf32, #tpu.memory_space<vmem>>, vector<1x64xf32>
    %4 = arith.mulf %0, %0 : vector<32x16xf32>
    %cst = arith.constant dense<0.000000e+00> : vector<32xf32>
    %5 = vector.multi_reduction <add>, %4, %cst [1] : vector<32x16xf32> to vector<32xf32>
    %6 = vector.shape_cast %5 : vector<32xf32> to vector<32x1xf32>
    %cst_7 = arith.constant dense<0.000000e+00> : vector<32x64xf32>
    %7 = tpu.matmul %0, %2, %cst_7 {dimension_numbers = #tpu.dot_dimension_numbers<[1], [1], [0], [0], [0, 0, 1, 0], [], []>} : vector<32x16xf32>, vector<64x16xf32>, vector<32x64xf32> -> vector<32x64xf32>
    %8 = vector.broadcast %3 : vector<1x64xf32> to vector<32x64xf32>
    %9 = vector.broadcast %6 : vector<32x1xf32> to vector<32x64xf32>
    %10 = arith.addf %8, %9 : vector<32x64xf32>
    %cst_8 = arith.constant 2.000000e+00 : f32
    %11 = vector.broadcast %cst_8 : f32 to vector<32x64xf32>
    %12 = arith.mulf %11, %7 : vector<32x64xf32>
    %13 = arith.subf %10, %12 : vector<32x64xf32>
    %cst_9 = arith.constant 0.000000e+00 : f32
    %14 = vector.broadcast %cst_9 : f32 to vector<32x64xf32>
    %15 = arith.subf %14, %13 : vector<32x64xf32>
    %16 = arith.addf %15, %1 : vector<32x64xf32>
    %cst_10 = arith.constant 2.500000e+00 : f32
    %17 = vector.broadcast %cst_10 : f32 to vector<32x64xf32>
    %18 = arith.mulf %16, %17 : vector<32x64xf32>
    %cst_11 = arith.constant dense<0xFF800000> : vector<32xf32>
    %19 = vector.multi_reduction <maximumf>, %18, %cst_11 [1] : vector<32x64xf32> to vector<32xf32>
    %20 = vector.shape_cast %19 : vector<32xf32> to vector<32x1xf32>
    %21 = vector.broadcast %20 : vector<32x1xf32> to vector<32x64xf32>
    %22 = arith.subf %18, %21 : vector<32x64xf32>
    %23 = math.exp %22 : vector<32x64xf32>
    %cst_12 = arith.constant dense<0.000000e+00> : vector<32xf32>
    %24 = vector.multi_reduction <add>, %23, %cst_12 [1] : vector<32x64xf32> to vector<32xf32>
    %25 = vector.shape_cast %24 : vector<32xf32> to vector<32x1xf32>
    %26 = tpu.reciprocal %25 {approx = true} : vector<32x1xf32> -> vector<32x1xf32>
    %27 = vector.broadcast %26 : vector<32x1xf32> to vector<32x64xf32>
    %28 = arith.mulf %23, %27 : vector<32x64xf32>
    %29 = tpu.iota {dimensions = array<i32: 1>} : vector<32x64xi32>
    %30 = vector.broadcast %20 : vector<32x1xf32> to vector<32x64xf32>
    %31 = arith.cmpf oge, %18, %30 : vector<32x64xf32>
    %c64_i32 = arith.constant 64 : i32
    %32 = vector.broadcast %c64_i32 : i32 to vector<32x64xi32>
    %33 = arith.select %31, %29, %32 : vector<32x64xi1>, vector<32x64xi32>
    %cst_13 = arith.constant dense<2147483647> : vector<32xi32>
    %34 = vector.multi_reduction <minsi>, %33, %cst_13 [1] : vector<32x64xi32> to vector<32xi32>
    %35 = vector.shape_cast %34 : vector<32xi32> to vector<32x1xi32>
    %c0_14 = arith.constant 0 : index
    %c0_15 = arith.constant 0 : index
    %36 = vector.load %arg6[%c0_14, %c0_15] : memref<32x1xi32, #tpu.memory_space<vmem>>, vector<32x1xi32>
    tpu.vector_store %arg6[%c0_14, %c0_15], %35 {strides = array<i32>} : memref<32x1xi32, #tpu.memory_space<vmem>>, vector<32x1xi32>,
    %cst_16 = arith.constant dense<0.000000e+00> : vector<16x32xf32>
    %37 = tpu.matmul %2, %28, %cst_16 {dimension_numbers = #tpu.dot_dimension_numbers<[0], [1], [1], [0], [0, 1, 1, 0], [], []>} : vector<64x16xf32>, vector<32x64xf32>, vector<16x32xf32> -> vector<16x32xf32>
    %c0_17 = arith.constant 0 : index
    %c0_18 = arith.constant 0 : index
    %38 = vector.load %arg5[%c0_17, %c0_18] : memref<16x32xf32, #tpu.memory_space<vmem>>, vector<16x32xf32>
    tpu.vector_store %arg5[%c0_17, %c0_18], %37 {strides = array<i32>} : memref<16x32xf32, #tpu.memory_space<vmem>>, vector<16x32xf32>,
    %cst_19 = arith.constant dense<0xFF800000> : vector<32xf32>
    %39 = vector.multi_reduction <maximumf>, %15, %cst_19 [1] : vector<32x64xf32> to vector<32xf32>
    %40 = vector.shape_cast %39 : vector<32xf32> to vector<32x1xf32>
    %41 = vector.broadcast %40 : vector<32x1xf32> to vector<32x64xf32>
    %42 = arith.subf %15, %41 : vector<32x64xf32>
    %43 = math.exp %42 : vector<32x64xf32>
    %cst_20 = arith.constant dense<0.000000e+00> : vector<32xf32>
    %44 = vector.multi_reduction <add>, %43, %cst_20 [1] : vector<32x64xf32> to vector<32xf32>
    %45 = vector.shape_cast %44 : vector<32xf32> to vector<32x1xf32>
    %46 = tpu.reciprocal %45 {approx = true} : vector<32x1xf32> -> vector<32x1xf32>
    %47 = vector.broadcast %46 : vector<32x1xf32> to vector<32x64xf32>
    %48 = arith.mulf %43, %47 : vector<32x64xf32>
    %49 = math.log %45 : vector<32x1xf32>
    %50 = vector.broadcast %49 : vector<32x1xf32> to vector<32x64xf32>
    %51 = arith.subf %42, %50 : vector<32x64xf32>
    %cst_21 = arith.constant 4.15888309 : f32
    %52 = vector.broadcast %cst_21 : f32 to vector<32x64xf32>
    %53 = arith.addf %51, %52 : vector<32x64xf32>
    %54 = arith.mulf %48, %53 : vector<32x64xf32>
    %55 = vector.shape_cast %54 : vector<32x64xf32> to vector<1x32x64xf32>
    %cst_22 = arith.constant dense<0.000000e+00> : vector<1xf32>
    %56 = vector.multi_reduction <add>, %55, %cst_22 [1, 2] : vector<1x32x64xf32> to vector<1xf32>
    %57 = vector.shape_cast %56 : vector<1xf32> to vector<1x1x1xf32>
    %58 = vector.extract %57[0, 0, 0] : f32 from vector<1x1x1xf32>
    %cst_23 = arith.constant 4.8828125E-4 : f32
    %59 = arith.mulf %58, %cst_23 : f32
    %60 = arith.mulf %48, %13 : vector<32x64xf32>
    %61 = vector.shape_cast %60 : vector<32x64xf32> to vector<1x32x64xf32>
    %cst_24 = arith.constant dense<0.000000e+00> : vector<1xf32>
    %62 = vector.multi_reduction <add>, %61, %cst_24 [1, 2] : vector<1x32x64xf32> to vector<1xf32>
    %63 = vector.shape_cast %62 : vector<1xf32> to vector<1x1x1xf32>
    %64 = vector.extract %63[0, 0, 0] : f32 from vector<1x1x1xf32>
    %cst_25 = arith.constant 4.8828125E-4 : f32
    %65 = arith.mulf %64, %cst_25 : f32
    %66 = vector.broadcast %59 : f32 to vector<1x1x1xf32>
    %c0_26 = arith.constant 0 : index
    %c0_27 = arith.constant 0 : index
    %c0_28 = arith.constant 0 : index
    %67 = vector.load %arg7[%c0_26, %c0_27, %c0_28] : memref<1x1x1xf32, #tpu.memory_space<vmem>>, vector<1x1x1xf32>
    tpu.vector_store %arg7[%c0_26, %c0_27, %c0_28], %66 {strides = array<i32>} : memref<1x1x1xf32, #tpu.memory_space<vmem>>, vector<1x1x1xf32>,
    %68 = vector.broadcast %65 : f32 to vector<1x1x1xf32>
    %c0_29 = arith.constant 0 : index
    %c0_30 = arith.constant 0 : index
    %c0_31 = arith.constant 0 : index
    %69 = vector.load %arg8[%c0_29, %c0_30, %c0_31] : memref<1x1x1xf32, #tpu.memory_space<vmem>>, vector<1x1x1xf32>
    tpu.vector_store %arg8[%c0_29, %c0_30, %c0_31], %68 {strides = array<i32>} : memref<1x1x1xf32, #tpu.memory_space<vmem>>, vector<1x1x1xf32>,
    return
  }
  func.func @transform_0(%arg0: i32) -> (i32, i32) {
    %c0_i32 = arith.constant 0 : i32
    %c0_i32_0 = arith.constant 0 : i32
    return %arg0, %c0_i32 : i32, i32
  }
  func.func @transform_1(%arg0: i32) -> (i32, i32) {
    %c0_i32 = arith.constant 0 : i32
    %c0_i32_0 = arith.constant 0 : i32
    return %arg0, %c0_i32 : i32, i32
  }
  func.func @transform_2(%arg0: i32) -> (i32, i32) {
    %c0_i32 = arith.constant 0 : i32
    %c0_i32_0 = arith.constant 0 : i32
    %c0_i32_1 = arith.constant 0 : i32
    return %c0_i32, %c0_i32_0 : i32, i32
  }
  func.func @transform_3(%arg0: i32) -> (i32, i32) {
    %c0_i32 = arith.constant 0 : i32
    %c0_i32_0 = arith.constant 0 : i32
    %c0_i32_1 = arith.constant 0 : i32
    return %c0_i32, %c0_i32_0 : i32, i32
  }
  func.func @transform_4(%arg0: i32) -> (i32, i32) {
    %c0_i32 = arith.constant 0 : i32
    %c0_i32_0 = arith.constant 0 : i32
    return %c0_i32, %arg0 : i32, i32
  }
  func.func @transform_5(%arg0: i32) -> (i32, i32) {
    %c0_i32 = arith.constant 0 : i32
    %c0_i32_0 = arith.constant 0 : i32
    return %arg0, %c0_i32 : i32, i32
  }
  func.func @transform_6(%arg0: i32) -> (i32, i32, i32) {
    %c0_i32 = arith.constant 0 : i32
    %c0_i32_0 = arith.constant 0 : i32
    %c0_i32_1 = arith.constant 0 : i32
    return %arg0, %c0_i32, %c0_i32_0 : i32, i32, i32
  }
  func.func @transform_7(%arg0: i32) -> (i32, i32, i32) {
    %c0_i32 = arith.constant 0 : i32
    %c0_i32_0 = arith.constant 0 : i32
    %c0_i32_1 = arith.constant 0 : i32
    return %arg0, %c0_i32, %c0_i32_0 : i32, i32, i32
  }
}

</mosaic_0001>

<bundles_post_ra>
// kernel: tpu_custom_call.1
= control target key start
LH: loop header
LB: loop body
LE: loop exit
PB: predicated region body
PF: predicated region fallthrough
CT: control target
= control target key end

     0   :  { %13 = vsyncpa [#allocation3], 0  ;;  %vm44_vm0 = vcmask 130048   ;;  %s1155_s0 = inlined_call_operand.vmem [shape: f32[32,16], index: 0, kind: input, shape index: {}]   ;;  %s1156_s1 = inlined_call_operand.vmem [shape: f32[32,64], index: 1, kind: input, shape index: {}]   ;;  %s1157_s2 = inlined_call_operand.vmem [shape: f32[64,16], index: 2, kind: input, shape index: {}]   ;;  %s1158_s3 = inlined_call_operand.vmem [shape: f32[1,64], index: 3, kind: input, shape index: {}]   ;;  %s1159_s4 = inlined_call_operand.hbm [shape: f32[16,32], index: 4, kind: output, shape index: {0}]   ;;  %s1160_s5 = inlined_call_operand.vmem [shape: s32[32,1], index: 5, kind: output, shape index: {1}]   ;;  %s1161_s6 = inlined_call_operand.hbm [shape: f32[1,1,1], index: 6, kind: output, shape index: {2}]   ;;  %s1162_s7 = inlined_call_operand.hbm [shape: f32[1,1,1], index: 7, kind: output, shape index: {3}]  }
   0x1   :  { %v842_v0 = vld [vmem:[%s1157_s2 + $0x38] sm:$0xff]  ;;  %v847_v1 = vld [vmem:[%s1157_s2 + $0x30] sm:$0xff]  ;;  %v23_v2 = vld [vmem:[%s1155_s0] sm:$0xff] }
   0x2   :  { %647 = vmatprep.subr.msk.mxu0 %vm44_vm0, %v842_v0  ;;  %663 = vmatprep.mubr.msk.f32.mxu0 %vm44_vm0, %v23_v2  ;;  %v24_v3 = vld [vmem:[%s1155_s0 + $0x8] sm:$0xff]  ;;  %v26_v4 = vld [vmem:[%s1155_s0 + $0x18] sm:$0xff]  ;;  %v40_v6 = vmul.f32 %v23_v2, %v23_v2  ;;  %v25_v7 = vld [vmem:[%s1155_s0 + $0x10] sm:$0xff] }
   0x3   :  { %648 = vmatpush3.xpose.msk.msra.mxu0 %vm44_vm0, %v842_v0  ;;  %v868_v5 = vld [vmem:[%s1157_s2 + $0x28] sm:$0xff]  ;;  %v41_v8 = vmul.f32 %v24_v3, %v24_v3  ;;  %v43_v9 = vmul.f32 %v26_v4, %v26_v4 }
   0x4   :  { %649 = vmatprep.subr.msk.mxu0 %vm44_vm0, %v847_v1 }
   0x5   :  { %14 = vsyncpa [#allocation5], 0  ;;  %v42_v10 = vmul.f32 %v25_v7, %v25_v7  ;;  %v48_v11 = vsel %vm44_vm0, %v41_v8, 0.0  ;;  %v54_v12 = vsel %vm44_vm0, %v43_v9, 0.0  ;;  %v882_v13 = vld [vmem:[%s1157_s2 + $0x20] sm:$0xff]  ;;  %v45_v14 = vsel %vm44_vm0, %v40_v6, 0.0 }
   0x6   :  { %49 = vadd.xlane.f32.xlu1 %v48_v11  ;;  %55 = vadd.xlane.f32.xlu0 %v54_v12  ;;  %v893_v16 = vld [vmem:[%s1157_s2 + $0x18] sm:$0xff]  ;;  %v902_v17 = vld [vmem:[%s1157_s2 + $0x10] sm:$0xff]  ;;  %v911_v18 = vld [vmem:[%s1157_s2 + $0x8] sm:$0xff]  ;;  %vm208_vm1 = vcmask 523264   ;;  %vm323_vm10 = vcmask 7168   ;;  %vm453_vm11 = vcmask 261120  }
   0x7   :  { %650 = vmatpush3.xpose.msk.msra.mxu0 %vm44_vm0, %v847_v1  ;;  %v51_v15 = vsel %vm44_vm0, %v42_v10, 0.0  ;;  %v920_v19 = vld [vmem:[%s1157_s2] sm:$0xff]  ;;  %v30_v41 = vld [vmem:[%s1156_s1 + $0x18] sm:$0xff]  ;;  %v28_v42 = vld [vmem:[%s1156_s1 + $0x8] sm:$0xff]  ;;  %s794_s16 = smov [#allocation4]   ;;  %s795_s18 = smov [#allocation2]  }
   0x8   :  { %651 = vmatprep.subr.msk.mxu0 %vm44_vm0, %v868_v5  ;;  %v622_v21 = vld [vmem:[%s1158_s3] ss:$0 sm:$0xff]  ;;  %v29_v46 = vld [vmem:[%s1156_s1 + $0x10] sm:$0xff]  ;;  %s583_s0 = sshll.u32 %s794_s16, 4  ;;  %s568_s19 = sshll.u32 %s795_s18, 4  ;;  %vm559_vm12 = vcmask 0   ;;  %s584_s0 = int_to_ptr.vmem [resolvable:$true] %s583_s0  ;;  %s1128_s19 = int_to_ptr.vmem [resolvable:$true] %s568_s19 }
   0x9   :  { %v27_v47 = vld [vmem:[%s1156_s1] sm:$0xff]  ;;  %s796_s21 = smov [#allocation6]   ;;  %s730_s24 = scalar_lea.vmem %s584_s0, 16 }
   0xa   :  { %46 = vadd.xlane.f32.xlu1 %v45_v14  ;;  %52 = vadd.xlane.f32.xlu0 %v51_v15  ;;  %s593_s22 = sshll.u32 %s796_s21, 4  ;;  %p731_p0 = scmp.ne.s32.totalorder %s584_s0, %s730_s24  ;;  %s1132_s22 = int_to_ptr.vmem [resolvable:$true] %s593_s22 }
   0xb   :  { %652 = vmatpush3.xpose.msk.msra.mxu0 %vm44_vm0, %v868_v5  ;;  %s734_s25 = scalar_lea.vmem %s584_s0, 32  ;;  %p735_p1 = scmp.lt.s32.totalorder %s584_s0, %s584_s0 }
   0xc   :  { %653 = vmatprep.subr.msk.mxu0 %vm44_vm0, %v882_v13  ;;  %p736_p2 = scmp.lt.s32.totalorder %s734_s25, %s730_s24 }
   0xe   :  { %p737_p3 = por %p736_p2, %p735_p1 }
   0xf   :  { %654 = vmatpush3.xpose.msk.msra.mxu0 %vm44_vm0, %v882_v13 }
  0x10   :  { %655 = vmatprep.subr.msk.mxu0 %vm44_vm0, %v893_v16  ;;  %p738_p4 = pnand %p737_p3, %p731_p0 }
  0x13   :  { %656 = vmatpush3.xpose.msk.msra.mxu0 %vm44_vm0, %v893_v16 }
  0x14   :  { %657 = vmatprep.subr.msk.mxu0 %vm44_vm0, %v902_v17 }
  0x17   :  { %658 = vmatpush3.xpose.msk.msra.mxu0 %vm44_vm0, %v902_v17 }
  0x18   :  { %659 = vmatprep.subr.msk.mxu0 %vm44_vm0, %v911_v18 }
  0x1b   :  { %660 = vmatpush3.xpose.msk.msra.mxu0 %vm44_vm0, %v911_v18 }
  0x1c   :  { %661 = vmatprep.subr.msk.mxu0 %vm44_vm0, %v920_v19 }
  0x1f   :  { %662 = vmatpush3.xpose.msk.msra.mxu0 %vm44_vm0, %v920_v19 }
  0x22   :  { %664 = vmatmul.mubr.msk.f32.vlgmr.msra.gmra.mxu0 %vm44_vm0, %v24_v3 }
  0x23   :  { %666 = vmatprep.mubr.msk.f32.mxu0 %vm44_vm0, %v25_v7 }
  0x26   :  { %667 = vmatmul.mubr.msk.f32.gmra.mxu0 %vm44_vm0, %v26_v4 }
  0x8f   :  { %v50_v20 = vpop.xlane.xlu1 %49  ;;  %v56_v22 = vpop.xlane.xlu0 %55 }
  0x90   :  { %v185_v24 = vadd.f32 %v622_v21, %v50_v20  ;;  %v187_v33 = vadd.f32 %v622_v21, %v56_v22 }
  0x93   :  { %v47_v23 = vpop.xlane.xlu1 %46  ;;  %v53_v29 = vpop.xlane.xlu0 %52 }
  0x94   :  { %v184_v27 = vadd.f32 %v622_v21, %v47_v23  ;;  %v186_v36 = vadd.f32 %v622_v21, %v53_v29 }
  0xe2   :  { %v665_v25 = vpop.f32.mrf.mxu0 }
  0xe3   :  { %v189_v26 = vmul.f32 2.0, %v665_v25 }
  0xe4   :  { %v159_v28 = vpop.f32.mrf.mxu0 }
  0xe5   :  { %v934_v30 = vsub.f32 %v185_v24, %v189_v26  ;;  %v188_v31 = vmul.f32 2.0, %v159_v28 }
  0xe6   :  { %v668_v32 = vpop.f32.mrf.mxu0 }
  0xe7   :  { %v936_v34 = vsub.f32 %v184_v27, %v188_v31  ;;  %v191_v35 = vmul.f32 2.0, %v668_v32  ;;  %v197_v38 = vsub.f32 0.0, %v934_v30 }
  0xe8   :  { %v169_v37 = vpop.f32.mrf.mxu0 }
  0xe9   :  { %v939_v39 = vsub.f32 %v187_v33, %v191_v35  ;;  %v190_v40 = vmul.f32 2.0, %v169_v37  ;;  %v196_v43 = vsub.f32 0.0, %v936_v34  ;;  %v201_v50 = vadd.f32 %v197_v38, %v28_v42 }
  0xea   :  { %v459_v62 = vsel %vm208_vm1, %v197_v38, -inf }
  0xeb   :  { %v199_v44 = vsub.f32 0.0, %v939_v39  ;;  %v949_v45 = vsub.f32 %v186_v36, %v190_v40  ;;  %v200_v53 = vadd.f32 %v196_v43, %v27_v47  ;;  %v964_v56 = vmul.f32 2.5, %v201_v50 }
  0xec   :  { %v456_v61 = vsel %vm208_vm1, %v196_v43, -inf }
  0xed   :  { %v198_v48 = vsub.f32 0.0, %v949_v45  ;;  %v203_v49 = vadd.f32 %v199_v44, %v30_v41  ;;  %v204_v58 = vmul.f32 2.5, %v200_v53  ;;  %v212_v59 = vsel %vm208_vm1, %v964_v56, -inf }
  0xee   :  { %v465_v2 = vsel %vm208_vm1, %v199_v44, -inf }
  0xef   :  { %v958_v51 = vmul.f32 2.5, %v203_v49  ;;  %v202_v52 = vadd.f32 %v198_v48, %v29_v46  ;;  %v209_v60 = vsel %vm208_vm1, %v204_v58, -inf  ;;  %v462_v63 = vsel %vm208_vm1, %v198_v48, -inf }
  0xf1   :  { %v218_v54 = vsel %vm208_vm1, %v958_v51, -inf  ;;  %v962_v55 = vmul.f32 2.5, %v202_v52 }
  0xf2   :  { %219 = vmax.xlane.f32.xlu0 %v218_v54 }
  0xf3   :  { %v215_v57 = vsel %vm208_vm1, %v962_v55, -inf }
  0xf4   :  { %216 = vmax.xlane.f32.xlu1 %v215_v57 }
  0xf6   :  { %213 = vmax.xlane.f32.xlu0 %v212_v59 }
  0xf8   :  { %210 = vmax.xlane.f32.xlu1 %v209_v60 }
  0xfa   :  { %457 = vmax.xlane.f32.xlu0 %v456_v61 }
  0xfc   :  { %460 = vmax.xlane.f32.xlu1 %v459_v62 }
  0xfe   :  { %463 = vmax.xlane.f32.xlu0 %v462_v63 }
 0x100   :  { %466 = vmax.xlane.f32.xlu1 %v465_v2 }
 0x17b   :  { %v975_v3 = vpop.xlane.xlu0 %219 }
 0x17c   :  { %v224_v4 = vsub.f32 %v958_v51, %v975_v3  ;;  %vm258_vm5 = vcmp.ge.f32.partialorder %v958_v51, %v975_v3 }
 0x17d   :  { %v979_v6 = vpop.xlane.xlu1 %216 }
 0x17e   :  { %v231_v7 = vmul.f32 1.442695, %v224_v4  ;;  %v223_v8 = vsub.f32 %v962_v55, %v979_v6  ;;  %vm257_vm4 = vcmp.ge.f32.partialorder %v962_v55, %v979_v6 }
 0x17f   :  { %v214_v9 = vpop.xlane.xlu0 %213 }
 0x180   :  { %690 = vpow2.f32 %v231_v7  ;;  %v229_v10 = vmul.f32 1.442695, %v223_v8  ;;  %v222_v11 = vsub.f32 %v964_v56, %v214_v9  ;;  %vm256_vm3 = vcmp.ge.f32.partialorder %v964_v56, %v214_v9 }
 0x181   :  { %v211_v12 = vpop.xlane.xlu1 %210 }
 0x182   :  { %692 = vpow2.f32 %v229_v10  ;;  %v227_v14 = vmul.f32 1.442695, %v222_v11  ;;  %v221_v15 = vsub.f32 %v204_v58, %v211_v12  ;;  %vm255_vm2 = vcmp.ge.f32.partialorder %v204_v58, %v211_v12 }
 0x183   :  { %v458_v20 = vpop.xlane.xlu0 %457 }
 0x184   :  { %694 = vpow2.f32 %v227_v14  ;;  %v225_v21 = vmul.f32 1.442695, %v221_v15  ;;  %v984_v22 = vsub.f32 %v196_v43, %v458_v20 }
 0x185   :  { %v461_v23 = vpop.xlane.xlu1 %460 }
 0x186   :  { %696 = vpow2.f32 %v225_v21  ;;  %v472_v24 = vmul.f32 1.442695, %v984_v22  ;;  %v987_v25 = vsub.f32 %v197_v38, %v461_v23  ;;  %v253_v38 = vlaneseq }
 0x187   :  { %v464_v26 = vpop.xlane.xlu0 %463 }
 0x188   :  { %698 = vpow2.f32 %v472_v24  ;;  %v474_v27 = vmul.f32 1.442695, %v987_v25  ;;  %v990_v28 = vsub.f32 %v198_v48, %v464_v26 }
 0x189   :  { %v467_v29 = vpop.xlane.xlu1 %466 }
 0x18a   :  { %700 = vpow2.f32 %v474_v27  ;;  %v476_v31 = vmul.f32 1.442695, %v990_v28  ;;  %v993_v32 = vsub.f32 %v199_v44, %v467_v29  ;;  %v254_v44 = vand.u32 127, %v253_v38 }
 0x18c   :  { %702 = vpow2.f32 %v476_v31  ;;  %v478_v33 = vmul.f32 1.442695, %v993_v32  ;;  %v259_v48 = vsel %vm255_vm2, %v254_v44, 64  ;;  %v260_v57 = vsel %vm256_vm3, %v254_v44, 64 }
 0x18d   :  { %v996_v35 = vpop.eup %690  ;;  %v1022_v53 = vsel %vm208_vm1, %v259_v48, 2147483647  ;;  %v1036_v61 = vsel %vm208_vm1, %v260_v57, 2147483647  ;;  %v261_v62 = vsel %vm257_vm4, %v254_v44, 64  ;;  %v262_v4 = vsel %vm258_vm5, %v254_v44, 64 }
 0x18e   :  { %704 = vpow2.f32 %v478_v33  ;;  %v242_v36 = vsel %vm208_vm1, %v996_v35, 0.0  ;;  %v265_v59 = vshra.s32 %v1022_v53, 16  ;;  %v280_v63 = vshra.s32 %v1036_v61, 16 }
 0x18f   :  { %v1000_v37 = vpop.eup %692  ;;  %243 = vadd.xlane.f32.xlu0 %v242_v36  ;;  %v1044_v2 = vsel %vm208_vm1, %v261_v62, 2147483647  ;;  %v1051_v8 = vsel %vm208_vm1, %v262_v4, 2147483647 }
 0x190   :  { %v239_v40 = vsel %vm208_vm1, %v1000_v37, 0.0  ;;  %v1040_v55 = vcvt.s32.f32 %v265_v59  ;;  %v1047_v6 = vcvt.s32.f32 %v280_v63  ;;  %v295_v7 = vshra.s32 %v1044_v2, 16 }
 0x191   :  { %v1004_v41 = vpop.eup %694  ;;  %240 = vadd.xlane.f32.xlu1 %v239_v40  ;;  %v310_v3 = vshra.s32 %v1051_v8, 16 }
 0x192   :  { %v236_v42 = vsel %vm208_vm1, %v1004_v41, 0.0  ;;  %v1054_v51 = vcvt.s32.f32 %v295_v7 }
 0x193   :  { %v1008_v43 = vpop.eup %696  ;;  %237 = vadd.xlane.f32.xlu0 %v236_v42  ;;  %v1058_v9 = vcvt.s32.f32 %v310_v3 }
 0x194   :  { %v233_v46 = vsel %vm208_vm1, %v1008_v43, 0.0 }
 0x195   :  { %v1012_v47 = vpop.eup %698  ;;  %234 = vadd.xlane.f32.xlu1 %v233_v46 }
 0x196   :  { %v480_v49 = vsel %vm208_vm1, %v1012_v47, 0.0 }
 0x197   :  { %v1017_v50 = vpop.eup %700  ;;  %481 = vadd.xlane.f32.xlu0 %v480_v49 }
 0x198   :  { %v483_v52 = vsel %vm208_vm1, %v1017_v50, 0.0 }
 0x199   :  { %v1024_v54 = vpop.eup %702  ;;  %484 = vadd.xlane.f32.xlu1 %v483_v52 }
 0x19a   :  { %v486_v56 = vsel %vm208_vm1, %v1024_v54, 0.0 }
 0x19b   :  { %v1030_v58 = vpop.eup %704  ;;  %487 = vadd.xlane.f32.xlu0 %v486_v56 }
 0x19c   :  { %v489_v60 = vsel %vm208_vm1, %v1030_v58, 0.0 }
 0x19d   :  { %490 = vadd.xlane.f32.xlu1 %v489_v60 }
 0x1a1   :  { %268 = vmin.xlane.f32.xlu1 %v1040_v55 }
 0x1a5   :  { %283 = vmin.xlane.f32.xlu1 %v1047_v6 }
 0x1a9   :  { %298 = vmin.xlane.f32.xlu1 %v1054_v51 }
 0x1ad   :  { %313 = vmin.xlane.f32.xlu1 %v1058_v9 }
 0x1c8   :  { %328 = vxpose.xlu0.b32.start [1/8] (short) (narrow) %v920_v19, 16 }
 0x1cc   :  { %329 = vxpose.xlu0.b32.cont [2/8] (short) (narrow) %v911_v18, 16 }
 0x1d0   :  { %330 = vxpose.xlu0.b32.cont [3/8] (short) (narrow) %v902_v17, 16 }
 0x1d4   :  { %331 = vxpose.xlu0.b32.cont [4/8] (short) (narrow) %v893_v16, 16 }
 0x1d8   :  { %332 = vxpose.xlu0.b32.cont [5/8] (short) (narrow) %v882_v13, 16 }
 0x1dc   :  { %333 = vxpose.xlu0.b32.cont [6/8] (short) (narrow) %v868_v5, 16 }
 0x1e0   :  { %334 = vxpose.xlu0.b32.cont [7/8] (short) (narrow) %v847_v1, 16 }
 0x1e4   :  { %335 = vxpose.xlu0.b32.end [8/8] (short) (narrow) %v842_v0, 16 }
 0x218   :  { %v244_v10 = vpop.xlane.xlu0 %243 }
 0x219   :  { %706 = vrcp.f32 %v244_v10 }
 0x21a   :  { %v241_v11 = vpop.xlane.xlu1 %240 }
 0x21b   :  { %708 = vrcp.f32 %v241_v11 }
 0x21c   :  { %v238_v12 = vpop.xlane.xlu0 %237 }
 0x21d   :  { %710 = vrcp.f32 %v238_v12 }
 0x21e   :  { %v235_v19 = vpop.xlane.xlu1 %234 }
 0x21f   :  { %712 = vrcp.f32 %v235_v19 }
 0x220   :  { %v482_v18 = vpop.xlane.xlu0 %481 }
 0x221   :  { %714 = vrcp.f32 %v482_v18 }
 0x222   :  { %716 = vlog2.f32 %v482_v18  ;;  %v485_v16 = vpop.xlane.xlu1 %484 }
 0x223   :  { %718 = vrcp.f32 %v485_v16 }
 0x224   :  { %720 = vlog2.f32 %v485_v16  ;;  %v488_v13 = vpop.xlane.xlu0 %487 }
 0x225   :  { %722 = vrcp.f32 %v488_v13 }
 0x226   :  { %v707_v5 = vpop.eup %706  ;;  %724 = vlog2.f32 %v488_v13  ;;  %v491_v1 = vpop.xlane.xlu1 %490 }
 0x227   :  { %726 = vrcp.f32 %v491_v1  ;;  %v252_v0 = vmul.f32 %v707_v5, %v996_v35 }
 0x228   :  { %v709_v17 = vpop.eup %708  ;;  %728 = vlog2.f32 %v491_v1  ;;  %v264_v1 = vand.u32 65535, %v1022_v53  ;;  %v294_v53 = vand.u32 65535, %v1044_v2 }
 0x229   :  { %669 = vmatprep.subr.msk.mxu1 %vm208_vm1, %v252_v0  ;;  %v251_v14 = vmul.f32 %v709_v17, %v1000_v37 }
 0x22a   :  { %v711_v15 = vpop.eup %710  ;;  %670 = vmatpush3.xpose.msk.msra.mxu1 %vm208_vm1, %v252_v0  ;;  %v269_v10 = vpop.xlane.xlu1 %268 }
 0x22b   :  { %671 = vmatprep.subr.msk.mxu1 %vm208_vm1, %v251_v14  ;;  %v250_v21 = vmul.f32 %v711_v15, %v1004_v41  ;;  %vm270_vm6 = vcmp.eq.f32.partialorder %v1040_v55, %v269_v10  ;;  %v296_v55 = vcvt.s32.f32 %v294_v53 }
 0x22c   :  { %v713_v20 = vpop.eup %712 }
 0x22d   :  { %v249_v31 = vmul.f32 %v713_v20, %v1008_v43 }
 0x22e   :  { %v715_v23 = vpop.eup %714  ;;  %672 = vmatpush3.xpose.msk.msra.mxu1 %vm208_vm1, %v251_v14  ;;  %v284_v5 = vpop.xlane.xlu1 %283  ;;  %v279_v14 = vand.u32 65535, %v1036_v61 }
 0x22f   :  { %v717_v24 = vpop.eup %716  ;;  %673 = vmatprep.subr.msk.mxu1 %vm208_vm1, %v250_v21  ;;  %v496_v33 = vmul.f32 %v715_v23, %v1012_v47  ;;  %vm285_vm7 = vcmp.eq.f32.partialorder %v1047_v6, %v284_v5 }
 0x230   :  { %v719_v26 = vpop.eup %718  ;;  %v501_v27 = vmul.f32 0.6931472, %v717_v24  ;;  %v281_v23 = vcvt.s32.f32 %v279_v14 }
 0x231   :  { %v721_v29 = vpop.eup %720  ;;  %v497_v35 = vmul.f32 %v719_v26, %v1017_v50  ;;  %v537_v49 = vmul.f32 %v496_v33, %v936_v34 }
 0x232   :  { %v723_v36 = vpop.eup %722  ;;  %v508_v37 = vsub.f32 %v984_v22, %v501_v27  ;;  %v503_v38 = vmul.f32 0.6931472, %v721_v29  ;;  %674 = vmatpush3.xpose.msk.msra.mxu1 %vm208_vm1, %v250_v21  ;;  %v299_v15 = vpop.xlane.xlu1 %298  ;;  %v286_v24 = vsel %vm285_vm7, %v281_v23, inf  ;;  %v309_v27 = vand.u32 65535, %v1051_v8 }
 0x233   :  { %v725_v40 = vpop.eup %724  ;;  %675 = vmatprep.subr.msk.mxu1 %vm208_vm1, %v249_v31  ;;  %v498_v41 = vmul.f32 %v723_v36, %v1024_v54  ;;  %v538_v47 = vmul.f32 %v497_v35, %v934_v30  ;;  %v541_v62 = vsel %vm208_vm1, %v537_v49, 0.0  ;;  %vm300_vm8 = vcmp.eq.f32.partialorder %v1054_v51, %v299_v15 }
 0x234   :  { %v727_v42 = vpop.eup %726  ;;  %v512_v44 = vadd.f32 4.158883, %v508_v37  ;;  %v509_v46 = vsub.f32 %v987_v25, %v503_v38  ;;  %v505_v43 = vmul.f32 0.6931472, %v725_v40  ;;  %v301_v61 = vsel %vm300_vm8, %v296_v55, inf }
 0x235   :  { %v729_v48 = vpop.eup %728  ;;  %v499_v56 = vmul.f32 %v727_v42, %v1030_v58  ;;  %v539_v54 = vmul.f32 %v498_v41, %v949_v45  ;;  %v542_v30 = vsel %vm208_vm1, %v538_v47, 0.0  ;;  %v311_v29 = vcvt.s32.f32 %v309_v27 }
 0x236   :  { %v513_v50 = vadd.f32 4.158883, %v509_v46  ;;  %v510_v22 = vsub.f32 %v990_v28, %v505_v43  ;;  %v507_v52 = vmul.f32 0.6931472, %v729_v48  ;;  %676 = vmatpush3.xpose.msk.msra.mxu1 %vm208_vm1, %v249_v31  ;;  %v516_v57 = vmul.f32 %v512_v44, %v496_v33  ;;  %v314_v26 = vpop.xlane.xlu1 %313 }
 0x237   :  { %v543_v3 = vadd.f32 %v542_v30, %v541_v62  ;;  %v540_v11 = vmul.f32 %v499_v56, %v939_v39  ;;  %v266_v39 = vcvt.s32.f32 %v264_v1  ;;  %vm315_vm9 = vcmp.eq.f32.partialorder %v1058_v9, %v314_v26 }
 0x238   :  { %v514_v59 = vadd.f32 4.158883, %v510_v22  ;;  %v511_v25 = vsub.f32 %v993_v32, %v507_v52  ;;  %v517_v60 = vmul.f32 %v513_v50, %v497_v35  ;;  %v520_v28 = vsel %vm208_vm1, %v516_v57, 0.0 }
 0x239   :  { %v544_v32 = vsel %vm208_vm1, %v539_v54, 0.0  ;;  %v546_v13 = vsel %vm208_vm1, %v540_v11, 0.0  ;;  %v271_v20 = vsel %vm270_vm6, %v266_v39, inf  ;;  %v316_v31 = vsel %vm315_vm9, %v311_v29, inf }
 0x23a   :  { %v515_v34 = vadd.f32 4.158883, %v511_v25  ;;  %v518_v63 = vmul.f32 %v514_v59, %v498_v41  ;;  %v521_v4 = vsel %vm208_vm1, %v517_v60, 0.0  ;;  %v545_v16 = vadd.f32 %v544_v32, %v543_v3 }
 0x23b   :  { %v522_v7 = vadd.f32 %v521_v4, %v520_v28  ;;  %v275_v36 = vcvt.f32.s32 %v269_v10  ;;  %v290_v44 = vcvt.f32.s32 %v284_v5  ;;  %v305_v22 = vcvt.f32.s32 %v299_v15 }
 0x23c   :  { %v519_v58 = vmul.f32 %v515_v34, %v499_v56  ;;  %v523_v45 = vsel %vm208_vm1, %v518_v63, 0.0  ;;  %v547_v0 = vadd.f32 %v546_v13, %v545_v16  ;;  %v320_v60 = vcvt.f32.s32 %v314_v26 }
 0x23d   :  { %v524_v12 = vadd.f32 %v523_v45, %v522_v7  ;;  %v276_v41 = vshll.u32 %v275_v36, 16  ;;  %v291_v50 = vshll.u32 %v290_v44, 16  ;;  %v306_v25 = vshll.u32 %v305_v22, 16 }
 0x23e   :  { %v525_v19 = vsel %vm208_vm1, %v519_v58, 0.0  ;;  %v321_v63 = vshll.u32 %v320_v60, 16 }
 0x23f   :  { %v526_v18 = vadd.f32 %v525_v19, %v524_v12 }
 0x241   :  { %527 = vadd.xlane.f32.xlu1 %v526_v18 }
 0x244   :  { %v344_v17 = vpop.trf.xlu0 }
 0x245   :  { %548 = vadd.xlane.f32.xlu1 %v547_v0  ;;  %677 = vmatprep.mubr.msk.f32.mxu1 %vm208_vm1, %v344_v17 }
 0x248   :  { %v345_v21 = vpop.trf.xlu0 }
 0x249   :  { %272 = vmin.xlane.f32.xlu1 %v271_v20  ;;  %678 = vmatmul.mubr.msk.f32.vlgmr.msra.gmra.mxu1 %vm208_vm1, %v345_v21 }
 0x24d   :  { %287 = vmin.xlane.f32.xlu1 %v286_v24 }
 0x251   :  { %302 = vmin.xlane.f32.xlu1 %v301_v61 }
 0x255   :  { %317 = vmin.xlane.f32.xlu1 %v316_v31 }
 0x2ca   :  { %v528_v33 = vpop.xlane.xlu1 %527 }
 0x2cb   :  { %v529_v6 = vrot.slane %v528_v33, 4 }
 0x2cd   :  { %v530_v35 = vadd.f32 %v529_v6, %v528_v33 }
 0x2ce   :  { %v549_v2 = vpop.xlane.xlu1 %548 }
 0x2cf   :  { %v531_v37 = vrot.slane %v530_v35, 2  ;;  %v550_v38 = vrot.slane %v549_v2, 4 }
 0x2d1   :  { %v551_v40 = vadd.f32 %v550_v38, %v549_v2  ;;  %v532_v51 = vadd.f32 %v531_v37, %v530_v35 }
 0x2d2   :  { %v273_v42 = vpop.xlane.xlu1 %272 }
 0x2d3   :  { %v552_v8 = vrot.slane %v551_v40, 2  ;;  %v274_v46 = vcvt.f32.s32 %v273_v42  ;;  %v533_v43 = vrot.slane %v532_v51, 1 }
 0x2d5   :  { %v277_v9 = vadd.s32 %v276_v41, %v274_v46  ;;  %v534_v47 = vadd.f32 %v533_v43, %v532_v51  ;;  %v553_v48 = vadd.f32 %v552_v8, %v551_v40 }
 0x2d6   :  { %v288_v49 = vpop.xlane.xlu1 %287 }
 0x2d7   :  { %324 = vst.msk [vmem:[%s1160_s5] sm:$0xff] %vm323_vm10, %v277_v9  ;;  %v289_v52 = vcvt.f32.s32 %v288_v49  ;;  %v554_v57 = vrot.slane %v553_v48, 1 }
 0x2d8   :  { %680 = vpush %v534_v47 }
 0x2d9   :  { %v292_v56 = vadd.s32 %v291_v50, %v289_v52  ;;  %v555_v54 = vadd.f32 %v554_v57, %v553_v48 }
 0x2da   :  { %v303_v59 = vpop.xlane.xlu1 %302 }
 0x2db   :  { %325 = vst.msk [vmem:[%s1160_s5 + $0x8] sm:$0xff] %vm323_vm10, %v292_v56  ;;  %v304_v30 = vcvt.f32.s32 %v303_v59 }
 0x2dc   :  { %682 = vpush %v555_v54 }
 0x2dd   :  { %v307_v62 = vadd.s32 %v306_v25, %v304_v30 }
 0x2de   :  { %v318_v34 = vpop.xlane.xlu1 %317 }
 0x2df   :  { %326 = vst.msk [vmem:[%s1160_s5 + $0x10] sm:$0xff] %vm323_vm10, %v307_v62  ;;  %v319_v28 = vcvt.f32.s32 %v318_v34 }
 0x2e1   :  { %v322_v4 = vadd.s32 %v321_v63, %v319_v28 }
 0x2e3   :  { %327 = vst.msk [vmem:[%s1160_s5 + $0x18] sm:$0xff] %vm323_vm10, %v322_v4 }
 0x309   :  { %s681_s17 = spop %680  ;;  %v679_v7 = vpop.f32.mrf.mxu1 }
 0x30a   :  { %s536_s20 = smul.f32 0.00048828125, %s681_s17  ;;  %455 = vst.msk [vmem:[#allocation2 + $0x8] sm:$0xff] %vm453_vm11, %v679_v7 }
 0x30b   :  { %v444_v10 = vpop.f32.mrf.mxu1 }
 0x30c   :  { %v558_v3 = vstv %s536_s20  ;;  %454 = vst.msk [vmem:[#allocation2] sm:$0xff] %vm453_vm11, %v444_v10 }
 0x30d   :  { %s683_s23 = spop %682  ;;  %560 = vst.msk [vmem:[#allocation4] sm:$0x1] %vm559_vm12, %v558_v3 }
 0x30e   :  { %s557_s5 = smul.f32 0.00048828125, %s683_s23 }
 0x30f   :  { %741 = shalt.err (!%p738_p4)
}
 0x310   :  { %586 = dma.vmem_to_hbm [thread:$0]  %s584_s0, 16, %s1161_s6, [#allocation5]   ;;  %v561_v58 = vstv %s557_s5 }
 0x311   :  { %562 = vst.msk [vmem:[#allocation6] sm:$0x1] %vm559_vm12, %v561_v58  ;;  %s750_s26 = scalar_lea.vmem %s1128_s19, 256  ;;  %p755_p6 = scmp.lt.s32.totalorder %s1128_s19, %s1128_s19 }
 0x312   :  { %p751_p5 = scmp.ne.s32.totalorder %s1128_s19, %s750_s26  ;;  %p756_p7 = scmp.lt.s32.totalorder %s750_s26, %s750_s26 }
 0x314   :  { %p757_p8 = por %p756_p7, %p755_p6 }
 0x316   :  { %p758_p9 = pnand %p757_p8, %p751_p5 }
 0x318   :  { %761 = shalt.err (!%p758_p9)
}
 0x319   :  { %s797_s27 = smov 128   ;;  %s798_s28 = smov 8  }
 0x31a   :  { %574 = dma.vmem_to_hbm [thread:$0]  %s1128_s19, 256, %s1159_s4, [#allocation3], %s797_s27, %s797_s27, %s798_s28  }
 0x31b   :  { %s770_s30 = scalar_lea.vmem %s1132_s22, 16  ;;  %s774_s8 = scalar_lea.vmem %s1132_s22, 32 }
 0x31c   :  { %p771_p10 = scmp.ne.s32.totalorder %s1132_s22, %s770_s30  ;;  %p775_p11 = scmp.lt.s32.totalorder %s1132_s22, %s1132_s22 }
 0x31d   :  { %p776_p12 = scmp.lt.s32.totalorder %s774_s8, %s770_s30 }
 0x31f   :  { %p777_p13 = por %p776_p12, %p775_p11 }
 0x321   :  { %p778_p0 = pnand %p777_p13, %p771_p10 }
 0x323   :  { %781 = shalt.err (!%p778_p0)
}
 0x324   :  { %596 = dma.vmem_to_hbm [thread:$0]  %s1132_s22, 16, %s1162_s7, [#allocation5]  }
 0x325   :  { %790 = dma.done.wait [#allocation3], 256  }
 0x326   :  { %791 = vsyncadd [#allocation3], 4294967040 }
 0x327   :  { %792 = dma.done.wait [#allocation5], 32  }
 0x328   :  { %793 = vsyncadd [#allocation5], 4294967264 }
 0x329   :  { %608 = vsyncpa [#allocation3], 1 }
 0x32a   :  { %609 = vsyncpa [#allocation5], 1 }

</bundles_post_ra>
